<compile_context>
chip_gen: v6e
topology: v6e:2x2x1
jax: 0.10.0
libtpu: 0.0.40
codegen_flags: <defaults>
</compile_context>

<pallas_src>
import jax
import jax.numpy as jnp
from jax.experimental import pallas as pl
from jax.experimental.pallas import tpu as pltpu

D_IN, D_H1, D_H2, D_OUT = 28 * 28, 256, 128, 10


def _round_up(x, m):
    return ((x + m - 1) // m) * m


def mlp_kernel(x_ref, w1_ref, b1_ref, w2_ref, b2_ref, w3_ref, b3_ref, o_ref):
    # x / weights are bf16; all matmul accumulation is f32 on the MXU,
    # bias add + ReLU in f32, then cast back to bf16 for the next matmul.
    x = x_ref[...]
    h1 = jnp.dot(x, w1_ref[...], preferred_element_type=jnp.float32) + b1_ref[...]
    h1 = jnp.maximum(h1, 0.0).astype(jnp.bfloat16)
    h2 = jnp.dot(h1, w2_ref[...], preferred_element_type=jnp.float32) + b2_ref[...]
    h2 = jnp.maximum(h2, 0.0).astype(jnp.bfloat16)
    out = jnp.dot(h2, w3_ref[...], preferred_element_type=jnp.float32) + b3_ref[...]
    o_ref[...] = out.astype(o_ref.dtype)


def mlp_forward(x, params, *, bm=1024, compute_dtype=jnp.bfloat16):
    """x: (B, 1, 28, 28) or anything flattening to (-1, 784). Returns (B, 10) f32."""
    w1, b1, w2, b2, w3, b3 = params

    # Single wrapper-side pass over x: reshape is a metadata op, then one cast.
    x2d = x.reshape(-1, D_IN).astype(compute_dtype)
    B = x2d.shape[0]

    # Batch tile: never larger than the (8-rounded) batch; if the batch is big
    # enough, ensure >= 2 grid steps so "parallel" sharding can use both v7x TCs.
    bm_eff = min(bm, _round_up(B, 8))
    if B > 8 and pl.cdiv(B, bm_eff) < 2:
        bm_eff = max(8, _round_up(pl.cdiv(B, 2), 8))
    grid = (pl.cdiv(B, bm_eff),)

    w1_c = w1.astype(compute_dtype)
    w2_c = w2.astype(compute_dtype)
    w3_c = w3.astype(compute_dtype)
    b1_f = b1.astype(jnp.float32)
    b2_f = b2.astype(jnp.float32)
    b3_f = b3.astype(jnp.float32)

    flops = 2 * B * (D_IN * D_H1 + D_H1 * D_H2 + D_H2 * D_OUT)
    bytes_accessed = (
        B * D_IN * 2                                   # x (bf16 in)
        + (D_IN * D_H1 + D_H1 * D_H2 + D_H2 * D_OUT) * 2  # weights (bf16)
        + (D_H1 + D_H2 + D_OUT) * 4                    # biases (f32)
        + B * D_OUT * 4                                # logits (f32 out)
    )

    out = pl.pallas_call(
        mlp_kernel,
        out_shape=jax.ShapeDtypeStruct((B, D_OUT), jnp.float32),
        grid_spec=pl.GridSpec(
            grid=grid,
            in_specs=[
                pl.BlockSpec((bm_eff, D_IN), lambda i: (i, 0)),   # x tile (streamed)
                pl.BlockSpec((D_IN, D_H1), lambda i: (0, 0)),     # W1 (resident)
                pl.BlockSpec((1, D_H1), lambda i: (0, 0)),        # b1
                pl.BlockSpec((D_H1, D_H2), lambda i: (0, 0)),     # W2
                pl.BlockSpec((1, D_H2), lambda i: (0, 0)),        # b2
                pl.BlockSpec((D_H2, D_OUT), lambda i: (0, 0)),    # W3
                pl.BlockSpec((1, D_OUT), lambda i: (0, 0)),       # b3
            ],
            out_specs=pl.BlockSpec((bm_eff, D_OUT), lambda i: (i, 0)),
        ),
        compiler_params=pltpu.CompilerParams(
            dimension_semantics=("parallel",),
            # Working set ~6 MiB at bm=1024 (x tile 1.5 MiB x2 buffers + weights
            # + f32 intermediates); budget VMEM explicitly so the same config is
            # safe on v5e (16 MiB default scoped) and v7x (64 MiB physical).
            vmem_limit_bytes=32 * 1024 * 1024,
        ),
        cost_estimate=pl.CostEstimate(
            flops=flops, transcendentals=0, bytes_accessed=bytes_accessed),
    )(x2d, w1_c, b1_f, w2_c, b2_f, w3_c, b3_f)

    return out


def init_params(key):
    """Deterministic init mimicking nn.Linear default (U[-1/sqrt(fan_in), +])."""
    def linear(k, fan_in, fan_out):
        kw, kb = jax.random.split(k)
        bound = 1.0 / jnp.sqrt(fan_in)
        w = jax.random.uniform(kw, (fan_in, fan_out), jnp.float32, -bound, bound)
        b = jax.random.uniform(kb, (1, fan_out), jnp.float32, -bound, bound)
        return w, b

    k1, k2, k3 = jax.random.split(key, 3)
    w1, b1 = linear(k1, D_IN, D_H1)
    w2, b2 = linear(k2, D_H1, D_H2)
    w3, b3 = linear(k3, D_H2, D_OUT)
    return (w1, b1, w2, b2, w3, b3)


def mlp_reference(x, params):
    """Pure-JAX f32 reference matching the PyTorch forward pass."""
    w1, b1, w2, b2, w3, b3 = params
    h = x.reshape(-1, D_IN).astype(jnp.float32)
    h = jnp.maximum(h @ w1 + b1, 0.0)
    h = jnp.maximum(h @ w2 + b2, 0.0)
    return h @ w3 + b3


if __name__ == "__main__":
    key = jax.random.PRNGKey(0)
    kx, kp = jax.random.split(key)

    # Small MNIST-like batch: NCHW (B=8, C=1, H=28, W=28). No padding passes:
    # the kernel streams an (8, 784) bf16 tile and writes (8, 10) f32 logits.
    x = jax.random.normal(kx, (8, 1, 28, 28), dtype=jnp.float32)
    params = init_params(kp)

    out = mlp_forward(x, params)
    out = jax.block_until_ready(out)

    ref = mlp_reference(x, params)
    assert out.shape == (8, 10), out.shape
    # bf16 operands with f32 accumulation -> slightly looser tolerance vs f32 ref.
    assert jnp.allclose(out, ref, atol=5e-2, rtol=5e-2), "mismatch vs reference"

    print("KERNEL_OK")
</pallas_src>

<mosaic_0001>
module attributes {stable_mosaic.version = 11 : i64} {
  func.func @mlp_kernel(%arg0: i32, %arg1: memref<8x784xbf16, #tpu.memory_space<vmem>>, %arg2: memref<784x256xbf16, #tpu.memory_space<vmem>>, %arg3: memref<1x256xf32, #tpu.memory_space<vmem>>, %arg4: memref<256x128xbf16, #tpu.memory_space<vmem>>, %arg5: memref<1x128xf32, #tpu.memory_space<vmem>>, %arg6: memref<128x10xbf16, #tpu.memory_space<vmem>>, %arg7: memref<1x10xf32, #tpu.memory_space<vmem>>, %arg8: memref<8x10xf32, #tpu.memory_space<vmem>>) attributes {dimension_semantics = [#tpu.dimension_semantics<parallel>], iteration_bounds = array<i64: 1>, scalar_prefetch = 0 : i64, scratch_operands = 0 : i64, tpu.core_type = #tpu.core_type<tc>, window_params = [{transform_indices = @transform_0, window_bounds = array<i64: 8, 784>}, {pipeline_mode = #tpu.pipeline_mode<synchronous>, transform_indices = @transform_1, window_bounds = array<i64: 784, 256>}, {pipeline_mode = #tpu.pipeline_mode<synchronous>, transform_indices = @transform_2, window_bounds = array<i64: 1, 256>}, {pipeline_mode = #tpu.pipeline_mode<synchronous>, transform_indices = @transform_3, window_bounds = array<i64: 256, 128>}, {pipeline_mode = #tpu.pipeline_mode<synchronous>, transform_indices = @transform_4, window_bounds = array<i64: 1, 128>}, {pipeline_mode = #tpu.pipeline_mode<synchronous>, transform_indices = @transform_5, window_bounds = array<i64: 128, 10>}, {pipeline_mode = #tpu.pipeline_mode<synchronous>, transform_indices = @transform_6, window_bounds = array<i64: 1, 10>}, {transform_indices = @transform_7, window_bounds = array<i64: 8, 10>}]} {
    %c0 = arith.constant 0 : index
    %c0_0 = arith.constant 0 : index
    %0 = vector.load %arg1[%c0, %c0_0] : memref<8x784xbf16, #tpu.memory_space<vmem>>, vector<8x784xbf16>
    %c0_1 = arith.constant 0 : index
    %c0_2 = arith.constant 0 : index
    %1 = vector.load %arg2[%c0_1, %c0_2] : memref<784x256xbf16, #tpu.memory_space<vmem>>, vector<784x256xbf16>
    %cst = arith.constant dense<0.000000e+00> : vector<8x256xf32>
    %2 = tpu.matmul %0, %1, %cst {dimension_numbers = #tpu.dot_dimension_numbers<[1], [0], [0], [1], [0, 0, 1, 1], [], []>} : vector<8x784xbf16>, vector<784x256xbf16>, vector<8x256xf32> -> vector<8x256xf32>
    %c0_3 = arith.constant 0 : index
    %c0_4 = arith.constant 0 : index
    %3 = vector.load %arg3[%c0_3, %c0_4] : memref<1x256xf32, #tpu.memory_space<vmem>>, vector<1x256xf32>
    %4 = vector.broadcast %3 : vector<1x256xf32> to vector<8x256xf32>
    %5 = arith.addf %2, %4 : vector<8x256xf32>
    %cst_5 = arith.constant 0.000000e+00 : f32
    %6 = vector.broadcast %cst_5 : f32 to vector<8x256xf32>
    %7 = arith.maximumf %5, %6 : vector<8x256xf32>
    %8 = arith.truncf %7 : vector<8x256xf32> to vector<8x256xbf16>
    %c0_6 = arith.constant 0 : index
    %c0_7 = arith.constant 0 : index
    %9 = vector.load %arg4[%c0_6, %c0_7] : memref<256x128xbf16, #tpu.memory_space<vmem>>, vector<256x128xbf16>
    %cst_8 = arith.constant dense<0.000000e+00> : vector<8x128xf32>
    %10 = tpu.matmul %8, %9, %cst_8 {dimension_numbers = #tpu.dot_dimension_numbers<[1], [0], [0], [1], [0, 0, 1, 1], [], []>} : vector<8x256xbf16>, vector<256x128xbf16>, vector<8x128xf32> -> vector<8x128xf32>
    %c0_9 = arith.constant 0 : index
    %c0_10 = arith.constant 0 : index
    %11 = vector.load %arg5[%c0_9, %c0_10] : memref<1x128xf32, #tpu.memory_space<vmem>>, vector<1x128xf32>
    %12 = vector.broadcast %11 : vector<1x128xf32> to vector<8x128xf32>
    %13 = arith.addf %10, %12 : vector<8x128xf32>
    %cst_11 = arith.constant 0.000000e+00 : f32
    %14 = vector.broadcast %cst_11 : f32 to vector<8x128xf32>
    %15 = arith.maximumf %13, %14 : vector<8x128xf32>
    %16 = arith.truncf %15 : vector<8x128xf32> to vector<8x128xbf16>
    %c0_12 = arith.constant 0 : index
    %c0_13 = arith.constant 0 : index
    %17 = vector.load %arg6[%c0_12, %c0_13] : memref<128x10xbf16, #tpu.memory_space<vmem>>, vector<128x10xbf16>
    %cst_14 = arith.constant dense<0.000000e+00> : vector<8x10xf32>
    %18 = tpu.matmul %16, %17, %cst_14 {dimension_numbers = #tpu.dot_dimension_numbers<[1], [0], [0], [1], [0, 0, 1, 1], [], []>} : vector<8x128xbf16>, vector<128x10xbf16>, vector<8x10xf32> -> vector<8x10xf32>
    %c0_15 = arith.constant 0 : index
    %c0_16 = arith.constant 0 : index
    %19 = vector.load %arg7[%c0_15, %c0_16] : memref<1x10xf32, #tpu.memory_space<vmem>>, vector<1x10xf32>
    %20 = vector.broadcast %19 : vector<1x10xf32> to vector<8x10xf32>
    %21 = arith.addf %18, %20 : vector<8x10xf32>
    %c0_17 = arith.constant 0 : index
    %c0_18 = arith.constant 0 : index
    %22 = vector.load %arg8[%c0_17, %c0_18] : memref<8x10xf32, #tpu.memory_space<vmem>>, vector<8x10xf32>
    tpu.vector_store %arg8[%c0_17, %c0_18], %21 {strides = array<i32>} : memref<8x10xf32, #tpu.memory_space<vmem>>, vector<8x10xf32>,
    return
  }
  func.func @transform_0(%arg0: i32) -> (i32, i32) {
    %c0_i32 = arith.constant 0 : i32
    %c0_i32_0 = arith.constant 0 : i32
    return %arg0, %c0_i32 : i32, i32
  }
  func.func @transform_1(%arg0: i32) -> (i32, i32) {
    %c0_i32 = arith.constant 0 : i32
    %c0_i32_0 = arith.constant 0 : i32
    %c0_i32_1 = arith.constant 0 : i32
    return %c0_i32, %c0_i32_0 : i32, i32
  }
  func.func @transform_2(%arg0: i32) -> (i32, i32) {
    %c0_i32 = arith.constant 0 : i32
    %c0_i32_0 = arith.constant 0 : i32
    %c0_i32_1 = arith.constant 0 : i32
    return %c0_i32, %c0_i32_0 : i32, i32
  }
  func.func @transform_3(%arg0: i32) -> (i32, i32) {
    %c0_i32 = arith.constant 0 : i32
    %c0_i32_0 = arith.constant 0 : i32
    %c0_i32_1 = arith.constant 0 : i32
    return %c0_i32, %c0_i32_0 : i32, i32
  }
  func.func @transform_4(%arg0: i32) -> (i32, i32) {
    %c0_i32 = arith.constant 0 : i32
    %c0_i32_0 = arith.constant 0 : i32
    %c0_i32_1 = arith.constant 0 : i32
    return %c0_i32, %c0_i32_0 : i32, i32
  }
  func.func @transform_5(%arg0: i32) -> (i32, i32) {
    %c0_i32 = arith.constant 0 : i32
    %c0_i32_0 = arith.constant 0 : i32
    %c0_i32_1 = arith.constant 0 : i32
    return %c0_i32, %c0_i32_0 : i32, i32
  }
  func.func @transform_6(%arg0: i32) -> (i32, i32) {
    %c0_i32 = arith.constant 0 : i32
    %c0_i32_0 = arith.constant 0 : i32
    %c0_i32_1 = arith.constant 0 : i32
    return %c0_i32, %c0_i32_0 : i32, i32
  }
  func.func @transform_7(%arg0: i32) -> (i32, i32) {
    %c0_i32 = arith.constant 0 : i32
    %c0_i32_0 = arith.constant 0 : i32
    return %arg0, %c0_i32 : i32, i32
  }
}

</mosaic_0001>

<bundles_post_ra>
// kernel: tpu_custom_call.1
= control target key start
LH: loop header
LB: loop body
LE: loop exit
PB: predicated region body
PF: predicated region fallthrough
CT: control target
= control target key end

     0   :  { %12 = vsyncpa [#allocation3], 0  ;;  %s1719_s0 = inlined_call_operand.vmem [shape: bf16[8,784], index: 0, kind: input, shape index: {}]   ;;  %s1720_s1 = inlined_call_operand.hbm [shape: bf16[784,256], index: 1, kind: input, shape index: {}]   ;;  %s1721_s2 = inlined_call_operand.vmem [shape: f32[1,256], index: 2, kind: input, shape index: {}]   ;;  %s1722_s3 = inlined_call_operand.hbm [shape: bf16[256,128], index: 3, kind: input, shape index: {}]   ;;  %s1723_s4 = inlined_call_operand.vmem [shape: f32[1,128], index: 4, kind: input, shape index: {}]   ;;  %s1724_s5 = inlined_call_operand.vmem [shape: bf16[128,10], index: 5, kind: input, shape index: {}]   ;;  %s1725_s6 = inlined_call_operand.vmem [shape: f32[1,10], index: 6, kind: input, shape index: {}]   ;;  %s1726_s7 = inlined_call_operand.hbm [shape: f32[8,10], index: 7, kind: output, shape index: {}]  }
   0x1   :  { %13 = vsyncpa [#allocation6], 0 }
   0x2   :  { %14 = vsyncpa [#allocation4], 0  ;;  %s1599_s24 = smov [#allocation2]  }
   0x3   :  { %s22_s25 = sshll.u32 %s1599_s24, 4  ;;  %s23_s25 = int_to_ptr.vmem [resolvable:$true] %s22_s25 }
   0x4   :  { %s1541_s26 = scalar_lea.vmem %s23_s25, 12544  ;;  %p1546_p1 = scmp.lt.s32.totalorder %s23_s25, %s23_s25 }
   0x5   :  { %p1542_p0 = scmp.ne.s32.totalorder %s23_s25, %s1541_s26  ;;  %p1547_p2 = scmp.lt.s32.totalorder %s1541_s26, %s1541_s26 }
   0x7   :  { %p1548_p3 = por %p1547_p2, %p1546_p1 }
   0x9   :  { %p1549_p4 = pnand %p1548_p3, %p1542_p0 }
   0xb   :  { %1552 = shalt.err (!%p1549_p4)
}
   0xc   :  { %s1600_s27 = smov 128   ;;  %s1601_s28 = smov 8  }
   0xd   :  { %28 = dma.hbm_to_vmem [thread:$0]  %s1720_s1, 12544, %s23_s25, [#allocation3], %s1600_s27, %s1600_s27, %s1601_s28  }
   0xe   :  { %s1602_s8 = smov [#allocation5]  }
   0xf   :  { %s36_s9 = sshll.u32 %s1602_s8, 4  ;;  %s37_s9 = int_to_ptr.vmem [resolvable:$true] %s36_s9 }
  0x10   :  { %s1561_s10 = scalar_lea.vmem %s37_s9, 2048  ;;  %p1566_p6 = scmp.lt.s32.totalorder %s37_s9, %s37_s9 }
  0x11   :  { %p1562_p5 = scmp.ne.s32.totalorder %s37_s9, %s1561_s10  ;;  %p1567_p7 = scmp.lt.s32.totalorder %s1561_s10, %s1561_s10 }
  0x13   :  { %p1568_p8 = por %p1567_p7, %p1566_p6 }
  0x15   :  { %p1569_p9 = pnand %p1568_p8, %p1562_p5 }
  0x17   :  { %1572 = shalt.err (!%p1569_p9)
}
  0x18   :  { %s1603_s11 = smov 64   ;;  %s1604_s12 = smov 4  }
  0x19   :  { %42 = dma.hbm_to_vmem [thread:$0]  %s1722_s3, 2048, %s37_s9, [#allocation6], %s1603_s11, %s1603_s11, %s1604_s12  }
  0x1a   :  { %1593 = dma.done.wait [#allocation3], 12544  }
  0x1b   :  { %1594 = vsyncadd [#allocation3], 4294954752 }
  0x1c   :  { %1595 = dma.done.wait [#allocation6], 2048  }
  0x1d   :  { %1596 = vsyncadd [#allocation6], 4294965248  ;;  %v1355_v0 = vld [vmem:[#allocation2 + $0x74] ss:$8 sps:$4 sm:$0xff]   ;;  %v1357_v1 = vld [vmem:[#allocation2 + $0x70] ss:$8 sps:$4 sm:$0xff]  }
  0x1e   :  { %688 = vmatprep.subr.bf16.mxu0 %v1355_v0  ;;  %v1358_v2 = vld [vmem:[#allocation2 + $0x174] ss:$8 sps:$4 sm:$0xff]   ;;  %v1360_v3 = vld [vmem:[#allocation2 + $0x170] ss:$8 sps:$4 sm:$0xff]   ;;  %v1361_v4 = vld [vmem:[#allocation2 + $0x64] ss:$8 sps:$4 sm:$0xff]  }
  0x1f   :  { %689 = vmatpush1.bf16.msra.mxu0 %v1357_v1  ;;  %v1363_v5 = vld [vmem:[#allocation2 + $0x60] ss:$8 sps:$4 sm:$0xff]   ;;  %729 = vmatprep.subr.bf16.mxu1 %v1358_v2  ;;  %v1364_v6 = vld [vmem:[#allocation2 + $0x164] ss:$8 sps:$4 sm:$0xff]   ;;  %v1367_v8 = vld [vmem:[#allocation2 + $0x54] ss:$8 sps:$4 sm:$0xff]  }
  0x20   :  { %730 = vmatpush1.bf16.msra.mxu1 %v1360_v3  ;;  %690 = vmatprep.subr.bf16.mxu0 %v1361_v4  ;;  %v1366_v7 = vld [vmem:[#allocation2 + $0x160] ss:$8 sps:$4 sm:$0xff]   ;;  %v1369_v9 = vld [vmem:[#allocation2 + $0x50] ss:$8 sps:$4 sm:$0xff]   ;;  %v1370_v10 = vld [vmem:[#allocation2 + $0x154] ss:$8 sps:$4 sm:$0xff]  }
  0x21   :  { %731 = vmatprep.subr.bf16.mxu1 %v1364_v6  ;;  %v1373_v11 = vld [vmem:[#allocation2 + $0x44] ss:$8 sps:$4 sm:$0xff]   ;;  %v1372_v12 = vld [vmem:[#allocation2 + $0x150] ss:$8 sps:$4 sm:$0xff]   ;;  %v1375_v14 = vld [vmem:[#allocation2 + $0x40] ss:$8 sps:$4 sm:$0xff]  }
  0x22   :  { %v1376_v13 = vld [vmem:[#allocation2 + $0x144] ss:$8 sps:$4 sm:$0xff]   ;;  %v1379_v15 = vld [vmem:[#allocation2 + $0x34] ss:$8 sps:$4 sm:$0xff]   ;;  %v1378_v16 = vld [vmem:[#allocation2 + $0x140] ss:$8 sps:$4 sm:$0xff]  }
  0x23   :  { %691 = vmatpush1.bf16.msra.mxu0 %v1363_v5  ;;  %v1382_v17 = vld [vmem:[#allocation2 + $0x134] ss:$8 sps:$4 sm:$0xff]   ;;  %v1381_v18 = vld [vmem:[#allocation2 + $0x30] ss:$8 sps:$4 sm:$0xff]   ;;  %v1385_v19 = vld [vmem:[#allocation2 + $0x24] ss:$8 sps:$4 sm:$0xff]  }
  0x24   :  { %692 = vmatprep.subr.bf16.mxu0 %v1367_v8  ;;  %732 = vmatpush1.bf16.msra.mxu1 %v1366_v7  ;;  %v1384_v20 = vld [vmem:[#allocation2 + $0x130] ss:$8 sps:$4 sm:$0xff]   ;;  %v1388_v21 = vld [vmem:[#allocation2 + $0x124] ss:$8 sps:$4 sm:$0xff]   ;;  %v1387_v22 = vld [vmem:[#allocation2 + $0x20] ss:$8 sps:$4 sm:$0xff]  }
  0x25   :  { %733 = vmatprep.subr.bf16.mxu1 %v1370_v10  ;;  %v1391_v23 = vld [vmem:[#allocation2 + $0x14] ss:$8 sps:$4 sm:$0xff]   ;;  %v1390_v24 = vld [vmem:[#allocation2 + $0x120] ss:$8 sps:$4 sm:$0xff]   ;;  %v1393_v26 = vld [vmem:[#allocation2 + $0x10] ss:$8 sps:$4 sm:$0xff]  }
  0x26   :  { %v1394_v25 = vld [vmem:[#allocation2 + $0x114] ss:$8 sps:$4 sm:$0xff]   ;;  %v1397_v27 = vld [vmem:[#allocation2 + $0x4] ss:$8 sps:$4 sm:$0xff]   ;;  %v1396_v28 = vld [vmem:[#allocation2 + $0x110] ss:$8 sps:$4 sm:$0xff]  }
  0x27   :  { %693 = vmatpush1.bf16.msra.mxu0 %v1369_v9  ;;  %v1400_v29 = vld [vmem:[#allocation2 + $0x104] ss:$8 sps:$4 sm:$0xff]   ;;  %v1399_v30 = vld [vmem:[#allocation2] ss:$8 sps:$4 sm:$0xff]   ;;  %v1403_v31 = vld [vmem:[#allocation2 + $0xf4] ss:$8 sps:$4 sm:$0xff]  }
  0x28   :  { %694 = vmatprep.subr.bf16.mxu0 %v1373_v11  ;;  %734 = vmatpush1.bf16.msra.mxu1 %v1372_v12  ;;  %v1402_v32 = vld [vmem:[#allocation2 + $0x100] ss:$8 sps:$4 sm:$0xff]   ;;  %v1406_v33 = vld [vmem:[#allocation2 + $0x1f4] ss:$8 sps:$4 sm:$0xff]   ;;  %v1405_v34 = vld [vmem:[#allocation2 + $0xf0] ss:$8 sps:$4 sm:$0xff]  }
  0x29   :  { %735 = vmatprep.subr.bf16.mxu1 %v1376_v13  ;;  %v1409_v35 = vld [vmem:[#allocation2 + $0xe4] ss:$8 sps:$4 sm:$0xff]   ;;  %v1408_v36 = vld [vmem:[#allocation2 + $0x1f0] ss:$8 sps:$4 sm:$0xff]   ;;  %v1411_v38 = vld [vmem:[#allocation2 + $0xe0] ss:$8 sps:$4 sm:$0xff]  }
  0x2a   :  { %v1412_v37 = vld [vmem:[#allocation2 + $0x1e4] ss:$8 sps:$4 sm:$0xff]   ;;  %v1415_v39 = vld [vmem:[#allocation2 + $0xd4] ss:$8 sps:$4 sm:$0xff]   ;;  %v1414_v40 = vld [vmem:[#allocation2 + $0x1e0] ss:$8 sps:$4 sm:$0xff]  }
  0x2b   :  { %695 = vmatpush1.bf16.msra.mxu0 %v1375_v14  ;;  %v1418_v41 = vld [vmem:[#allocation2 + $0x1d4] ss:$8 sps:$4 sm:$0xff]   ;;  %v1417_v42 = vld [vmem:[#allocation2 + $0xd0] ss:$8 sps:$4 sm:$0xff]   ;;  %v1421_v43 = vld [vmem:[#allocation2 + $0xc4] ss:$8 sps:$4 sm:$0xff]  }
  0x2c   :  { %696 = vmatprep.subr.bf16.mxu0 %v1379_v15  ;;  %736 = vmatpush1.bf16.msra.mxu1 %v1378_v16  ;;  %v1420_v44 = vld [vmem:[#allocation2 + $0x1d0] ss:$8 sps:$4 sm:$0xff]   ;;  %v1424_v45 = vld [vmem:[#allocation2 + $0x1c4] ss:$8 sps:$4 sm:$0xff]   ;;  %v1423_v47 = vld [vmem:[#allocation2 + $0xc0] ss:$8 sps:$4 sm:$0xff]  }
  0x2d   :  { %737 = vmatprep.subr.bf16.mxu1 %v1382_v17  ;;  %v56_v46 = vld [vmem:[%s1719_s0] sm:$0xff]  ;;  %v1427_v49 = vld [vmem:[#allocation2 + $0xb4] ss:$8 sps:$4 sm:$0xff]   ;;  %v57_v50 = vld [vmem:[%s1719_s0 + $0x8] sm:$0xff]  ;;  %vm684_vm0 = vcmask 130048   ;;  %v1605_v16 = vmov 0  }
  0x2e   :  { %v1163_v48 = vcombine.high %v56_v46, %v56_v46  ;;  %v1426_v51 = vld [vmem:[#allocation2 + $0x1c0] ss:$8 sps:$4 sm:$0xff]   ;;  %v1165_v52 = vcombine.high %v57_v50, %v57_v50  ;;  %v1430_v53 = vld [vmem:[#allocation2 + $0x1b4] ss:$8 sps:$4 sm:$0xff]   ;;  %v1429_v54 = vld [vmem:[#allocation2 + $0xb0] ss:$8 sps:$4 sm:$0xff]   ;;  %v1162_v5 = vcombine.low %v56_v46, %v56_v46  ;;  %v1164_v7 = vcombine.low %v57_v50, %v57_v50 }
  0x2f   :  { %697 = vmatpush1.bf16.msra.mxu0 %v1381_v18  ;;  %v1433_v55 = vld [vmem:[#allocation2 + $0xa4] ss:$8 sps:$4 sm:$0xff]   ;;  %v1432_v56 = vld [vmem:[#allocation2 + $0x1b0] ss:$8 sps:$4 sm:$0xff]   ;;  %v1435_v58 = vld [vmem:[#allocation2 + $0xa0] ss:$8 sps:$4 sm:$0xff]  }
  0x30   :  { %698 = vmatprep.subr.bf16.mxu0 %v1385_v19  ;;  %738 = vmatpush1.bf16.msra.mxu1 %v1384_v20  ;;  %v1436_v57 = vld [vmem:[#allocation2 + $0x1a4] ss:$8 sps:$4 sm:$0xff]   ;;  %v1439_v59 = vld [vmem:[#allocation2 + $0x94] ss:$8 sps:$4 sm:$0xff]   ;;  %v1438_v60 = vld [vmem:[#allocation2 + $0x1a0] ss:$8 sps:$4 sm:$0xff]  }
  0x31   :  { %739 = vmatprep.subr.bf16.mxu1 %v1388_v21  ;;  %720 = vmatprep.mubr.bf16.mxu0 %v1163_v48  ;;  %v1442_v61 = vld [vmem:[#allocation2 + $0x194] ss:$8 sps:$4 sm:$0xff]   ;;  %v1441_v62 = vld [vmem:[#allocation2 + $0x90] ss:$8 sps:$4 sm:$0xff]   ;;  %v1445_v63 = vld [vmem:[#allocation2 + $0x84] ss:$8 sps:$4 sm:$0xff]  }
  0x32   :  { %761 = vmatprep.mubr.bf16.mxu1 %v1165_v52  ;;  %v1444_v0 = vld [vmem:[#allocation2 + $0x190] ss:$8 sps:$4 sm:$0xff]   ;;  %v1448_v1 = vld [vmem:[#allocation2 + $0x184] ss:$8 sps:$4 sm:$0xff]   ;;  %v1447_v2 = vld [vmem:[#allocation2 + $0x80] ss:$8 sps:$4 sm:$0xff]  }
  0x33   :  { %699 = vmatpush1.bf16.msra.mxu0 %v1387_v22  ;;  %v1455_v3 = vld [vmem:[#allocation2 + $0x274] ss:$8 sps:$4 sm:$0xff]   ;;  %v1452_v4 = vld [vmem:[#allocation2 + $0x180] ss:$8 sps:$4 sm:$0xff]   ;;  %v1453_v6 = vld [vmem:[#allocation2 + $0x270] ss:$8 sps:$4 sm:$0xff]  }
  0x34   :  { %700 = vmatprep.subr.bf16.mxu0 %v1391_v23  ;;  %740 = vmatpush1.bf16.msra.mxu1 %v1390_v24  ;;  %v1460_v8 = vld [vmem:[#allocation2 + $0x264] ss:$8 sps:$4 sm:$0xff]   ;;  %v1500_v10 = vld [vmem:[#allocation2 + $0x300] ss:$8 sps:$4 sm:$0xff]   ;;  %v1664_v12 = vld [vmem:[%s1719_s0 + $0x10] sm:$0xff]  ;;  %vm1607_vm1 = vmmov 0  }
  0x35   :  { %741 = vmatprep.subr.bf16.mxu1 %v1394_v25  ;;  %v1502_v9 = vld [vmem:[#allocation2 + $0x304] ss:$8 sps:$4 sm:$0xff]   ;;  %v1458_v11 = vld [vmem:[#allocation2 + $0x260] ss:$8 sps:$4 sm:$0xff]   ;;  %v1463_v13 = vld [vmem:[#allocation2 + $0x254] ss:$8 sps:$4 sm:$0xff]   ;;  %v1167_v14 = vcombine.high %v1664_v12, %v1664_v12 }
  0x36   :  { %v1461_v15 = vld [vmem:[#allocation2 + $0x250] ss:$8 sps:$4 sm:$0xff]   ;;  %v1466_v17 = vld [vmem:[#allocation2 + $0x244] ss:$8 sps:$4 sm:$0xff]   ;;  %v1464_v19 = vld [vmem:[#allocation2 + $0x240] ss:$8 sps:$4 sm:$0xff]  }
  0x37   :  { %701 = vmatpush1.bf16.msra.mxu0 %v1393_v26  ;;  %v1506_v18 = vld [vmem:[%s1719_s0 + $0x18] ss:$0 sps:$4 sm:$0xff]   ;;  %v1469_v20 = vld [vmem:[#allocation2 + $0x234] ss:$8 sps:$4 sm:$0xff]   ;;  %v1472_v22 = vld [vmem:[#allocation2 + $0x224] ss:$8 sps:$4 sm:$0xff]  }
  0x38   :  { %702 = vmatprep.subr.bf16.mxu0 %v1397_v27  ;;  %742 = vmatpush1.bf16.msra.mxu1 %v1396_v28  ;;  %v1467_v21 = vld [vmem:[#allocation2 + $0x230] ss:$8 sps:$4 sm:$0xff]   ;;  %v1470_v23 = vld [vmem:[#allocation2 + $0x220] ss:$8 sps:$4 sm:$0xff]   ;;  %v1475_v24 = vld [vmem:[#allocation2 + $0x214] ss:$8 sps:$4 sm:$0xff]  }
  0x39   :  { %743 = vmatprep.subr.bf16.mxu1 %v1400_v29  ;;  %v1473_v25 = vld [vmem:[#allocation2 + $0x210] ss:$8 sps:$4 sm:$0xff]   ;;  %v1478_v26 = vld [vmem:[#allocation2 + $0x204] ss:$8 sps:$4 sm:$0xff]   ;;  %v1476_v27 = vld [vmem:[#allocation2 + $0x200] ss:$8 sps:$4 sm:$0xff]  }
  0x3a   :  { %v1481_v28 = vld [vmem:[#allocation2 + $0x2f4] ss:$8 sps:$4 sm:$0xff]   ;;  %v1479_v29 = vld [vmem:[#allocation2 + $0x2f0] ss:$8 sps:$4 sm:$0xff]   ;;  %v1510_v46 = vld [vmem:[#allocation5 + $0x38] sm:$0xff]   ;;  %vm1144_vm2 = vcmask 80896  }
  0x3b   :  { %703 = vmatpush1.bf16.msra.mxu0 %v1399_v30  ;;  %v1484_v30 = vld [vmem:[#allocation2 + $0x2e4] ss:$8 sps:$4 sm:$0xff]   ;;  %v1514_v50 = vld [vmem:[#allocation5 + $0x28] sm:$0xff]   ;;  %v1516_v52 = vld [vmem:[#allocation5 + $0x20] sm:$0xff]  }
  0x3c   :  { %704 = vmatprep.subr.bf16.mxu0 %v1403_v31  ;;  %744 = vmatpush1.bf16.msra.mxu1 %v1402_v32  ;;  %v1482_v31 = vld [vmem:[#allocation2 + $0x2e0] ss:$8 sps:$4 sm:$0xff]   ;;  %v1487_v32 = vld [vmem:[#allocation2 + $0x2d4] ss:$8 sps:$4 sm:$0xff]  }
  0x3d   :  { %745 = vmatprep.subr.bf16.mxu1 %v1406_v33  ;;  %v1485_v33 = vld [vmem:[#allocation2 + $0x2d0] ss:$8 sps:$4 sm:$0xff]   ;;  %v1512_v48 = vld [vmem:[#allocation5 + $0x30] sm:$0xff]  }
  0x3f   :  { %705 = vmatpush2.bf16.msra.mxu0 %v1405_v34  ;;  %v1490_v34 = vld [vmem:[#allocation2 + $0x2c4] ss:$8 sps:$4 sm:$0xff]  }
  0x40   :  { %706 = vmatprep.subr.bf16.mxu0 %v1409_v35  ;;  %746 = vmatpush2.bf16.msra.mxu1 %v1408_v36  ;;  %v1488_v35 = vld [vmem:[#allocation2 + $0x2c0] ss:$8 sps:$4 sm:$0xff]   ;;  %v1493_v36 = vld [vmem:[#allocation2 + $0x2b4] ss:$8 sps:$4 sm:$0xff]  }
  0x41   :  { %747 = vmatprep.subr.bf16.mxu1 %v1412_v37  ;;  %v1491_v37 = vld [vmem:[#allocation2 + $0x2b0] ss:$8 sps:$4 sm:$0xff]  }
  0x43   :  { %707 = vmatpush2.bf16.msra.mxu0 %v1411_v38  ;;  %v1496_v38 = vld [vmem:[#allocation2 + $0x2a4] ss:$8 sps:$4 sm:$0xff]  }
  0x44   :  { %708 = vmatprep.subr.bf16.mxu0 %v1415_v39  ;;  %748 = vmatpush2.bf16.msra.mxu1 %v1414_v40  ;;  %v1494_v39 = vld [vmem:[#allocation2 + $0x2a0] ss:$8 sps:$4 sm:$0xff]   ;;  %v1499_v40 = vld [vmem:[#allocation2 + $0x294] ss:$8 sps:$4 sm:$0xff]  }
  0x45   :  { %749 = vmatprep.subr.bf16.mxu1 %v1418_v41  ;;  %v1497_v41 = vld [vmem:[#allocation2 + $0x290] ss:$8 sps:$4 sm:$0xff]  }
  0x47   :  { %709 = vmatpush2.bf16.msra.mxu0 %v1417_v42  ;;  %v1505_v42 = vld [vmem:[#allocation2 + $0x284] ss:$8 sps:$4 sm:$0xff]  }
  0x48   :  { %710 = vmatprep.subr.bf16.mxu0 %v1421_v43  ;;  %750 = vmatpush2.bf16.msra.mxu1 %v1420_v44  ;;  %v1503_v43 = vld [vmem:[#allocation2 + $0x280] ss:$8 sps:$4 sm:$0xff]   ;;  %v1166_v44 = vcombine.low %v1664_v12, %v1664_v12 }
  0x49   :  { %751 = vmatprep.subr.bf16.mxu1 %v1424_v45  ;;  %v1509_v45 = vld [vmem:[#allocation5 + $0x78] sm:$0xff]  }
  0x4b   :  { %711 = vmatpush2.bf16.msra.mxu0 %v1423_v47  ;;  %v1511_v47 = vld [vmem:[#allocation5 + $0x70] sm:$0xff]  }
  0x4c   :  { %712 = vmatprep.subr.bf16.mxu0 %v1427_v49  ;;  %752 = vmatpush2.bf16.msra.mxu1 %v1426_v51  ;;  %v1513_v49 = vld [vmem:[#allocation5 + $0x68] sm:$0xff]   ;;  %v1515_v51 = vld [vmem:[#allocation5 + $0x60] sm:$0xff]  }
  0x4d   :  { %753 = vmatprep.subr.bf16.mxu1 %v1430_v53  ;;  %v1517_v53 = vld [vmem:[#allocation5 + $0x58] sm:$0xff]  }
  0x4f   :  { %713 = vmatpush2.bf16.msra.mxu0 %v1429_v54  ;;  %v1518_v54 = vld [vmem:[#allocation5 + $0x18] sm:$0xff]  }
  0x50   :  { %714 = vmatprep.subr.bf16.mxu0 %v1433_v55  ;;  %754 = vmatpush2.bf16.msra.mxu1 %v1432_v56  ;;  %v1519_v55 = vld [vmem:[#allocation5 + $0x50] sm:$0xff]  }
  0x51   :  { %755 = vmatprep.subr.bf16.mxu1 %v1436_v57  ;;  %v1520_v56 = vld [vmem:[#allocation5 + $0x10] sm:$0xff]   ;;  %v1521_v57 = vld [vmem:[#allocation5 + $0x48] sm:$0xff]  }
  0x53   :  { %715 = vmatpush2.bf16.msra.mxu0 %v1435_v58  ;;  %v1522_v58 = vld [vmem:[#allocation5 + $0x8] sm:$0xff]  }
  0x54   :  { %716 = vmatprep.subr.bf16.mxu0 %v1439_v59  ;;  %756 = vmatpush2.bf16.msra.mxu1 %v1438_v60  ;;  %v1523_v59 = vld [vmem:[#allocation5 + $0x40] sm:$0xff]  }
  0x55   :  { %757 = vmatprep.subr.bf16.mxu1 %v1442_v61  ;;  %v1524_v60 = vld [vmem:[#allocation5] sm:$0xff]   ;;  %v1606_v61 = vmov 0.0  }
  0x57   :  { %717 = vmatpush2.bf16.msra.mxu0 %v1441_v62 }
  0x58   :  { %718 = vmatprep.subr.bf16.mxu0 %v1445_v63  ;;  %758 = vmatpush2.bf16.msra.mxu1 %v1444_v0 }
  0x59   :  { %759 = vmatprep.subr.bf16.mxu1 %v1448_v1 }
  0x5b   :  { %719 = vmatpush2.bf16.msra.mxu0 %v1447_v2 }
  0x5c   :  { %770 = vmatprep.subr.bf16.mxu0 %v1455_v3  ;;  %760 = vmatpush2.bf16.msra.mxu1 %v1452_v4 }
  0x5d   :  { %825 = vmatprep.subr.bf16.mxu1 %v1502_v9 }
  0x5e   :  { %721 = vmatmul.mubr.bf16.vlgmr.msra.gmra.mxu0 %v1162_v5 }
  0x5f   :  { %771 = vmatpush1.bf16.msra.mxu0 %v1453_v6  ;;  %762 = vmatmul.mubr.bf16.vlgmr.msra.gmra.mxu1 %v1164_v7 }
  0x60   :  { %772 = vmatprep.subr.bf16.mxu0 %v1460_v8  ;;  %826 = vmatpush1.bf16.msra.mxu1 %v1500_v10  ;;  %v160_v10 = vlaneseq }
  0x61   :  { %843 = vmatprep.mubr.bf16.mxu1 %v1605_v16  ;;  %802 = vmatprep.mubr.bf16.mxu0 %v1167_v14 }
  0x62   :  { %1294 = vmatprep.subr.bf16.mxu1 %v1509_v45 }
  0x63   :  { %773 = vmatpush1.bf16.msra.mxu0 %v1458_v11  ;;  %v161_v11 = vshrl.u32 %v160_v10, 7 }
  0x64   :  { %774 = vmatprep.subr.bf16.mxu0 %v1463_v13  ;;  %v158_v13 = vld [vmem:[%s1721_s2] sm:$0x3] }
  0x65   :  { %v162_v12 = vsub.s32 0, %v161_v11  ;;  %v166_v14 = vsub.s32 1, %v161_v11 }
  0x67   :  { %775 = vmatpush1.bf16.msra.mxu0 %v1461_v15  ;;  %1267 = vmatmul.mubr.msk.bf16.vlgmr.msra.gmra.mxu1 %vm684_vm0, %v1506_v18  ;;  %v163_v15 = vrot.slane %v158_v13, %v162_v12  ;;  %v167_v16 = vrot.slane %v158_v13, %v166_v14 }
  0x68   :  { %776 = vmatprep.subr.bf16.mxu0 %v1466_v17  ;;  %1295 = vmatpush3.bf16.msra.mxu1 %v1510_v46 }
  0x69   :  { %1296 = vmatprep.subr.bf16.mxu1 %v1511_v47 }
  0x6b   :  { %777 = vmatpush1.bf16.msra.mxu0 %v1464_v19 }
  0x6c   :  { %778 = vmatprep.subr.bf16.mxu0 %v1469_v20  ;;  %1297 = vmatpush3.bf16.msra.mxu1 %v1512_v48 }
  0x6d   :  { %1298 = vmatprep.subr.bf16.mxu1 %v1513_v49 }
  0x6f   :  { %779 = vmatpush1.bf16.msra.mxu0 %v1467_v21 }
  0x70   :  { %780 = vmatprep.subr.bf16.mxu0 %v1472_v22  ;;  %1299 = vmatpush3.bf16.msra.mxu1 %v1514_v50  ;;  %v1285_v50 = vld [vmem:[%s1725_s6] ss:$0 sm:$0xff] }
  0x71   :  { %1300 = vmatprep.subr.bf16.mxu1 %v1515_v51 }
  0x73   :  { %781 = vmatpush1.bf16.msra.mxu0 %v1470_v23 }
  0x74   :  { %782 = vmatprep.subr.bf16.mxu0 %v1475_v24  ;;  %1301 = vmatpush3.bf16.msra.mxu1 %v1516_v52 }
  0x75   :  { %1302 = vmatprep.subr.bf16.mxu1 %v1517_v53 }
  0x77   :  { %783 = vmatpush1.bf16.msra.mxu0 %v1473_v25 }
  0x78   :  { %784 = vmatprep.subr.bf16.mxu0 %v1478_v26  ;;  %1303 = vmatpush3.bf16.msra.mxu1 %v1518_v54 }
  0x79   :  { %1304 = vmatprep.subr.bf16.mxu1 %v1519_v55 }
  0x7b   :  { %785 = vmatpush1.bf16.msra.mxu0 %v1476_v27 }
  0x7c   :  { %786 = vmatprep.subr.bf16.mxu0 %v1481_v28  ;;  %1305 = vmatpush3.bf16.msra.mxu1 %v1520_v56 }
  0x7d   :  { %1306 = vmatprep.subr.bf16.mxu1 %v1521_v57 }
  0x7f   :  { %787 = vmatpush2.bf16.msra.mxu0 %v1479_v29 }
  0x80   :  { %788 = vmatprep.subr.bf16.mxu0 %v1484_v30  ;;  %1307 = vmatpush3.bf16.msra.mxu1 %v1522_v58 }
  0x81   :  { %1308 = vmatprep.subr.bf16.mxu1 %v1523_v59 }
  0x83   :  { %789 = vmatpush2.bf16.msra.mxu0 %v1482_v31 }
  0x84   :  { %790 = vmatprep.subr.bf16.mxu0 %v1487_v32  ;;  %1309 = vmatpush3.bf16.msra.mxu1 %v1524_v60  ;;  %v1525_v32 = vld [vmem:[%s1724_s5 + $0x38] sm:$0xff]  }
  0x85   :  { %1325 = vmatprep.subr.bf16.mxu1 %v1606_v61 }
  0x87   :  { %791 = vmatpush2.bf16.msra.mxu0 %v1485_v33 }
  0x88   :  { %792 = vmatprep.subr.bf16.mxu0 %v1490_v34  ;;  %v1526_v34 = vld [vmem:[%s1724_s5 + $0x30] sm:$0xff]  }
  0x8b   :  { %793 = vmatpush2.bf16.msra.mxu0 %v1488_v35  ;;  %v1527_v35 = vld [vmem:[%s1724_s5 + $0x28] sm:$0xff]  }
  0x8c   :  { %794 = vmatprep.subr.bf16.mxu0 %v1493_v36  ;;  %v1528_v36 = vld [vmem:[%s1724_s5 + $0x20] sm:$0xff]  }
  0x8f   :  { %795 = vmatpush2.bf16.msra.mxu0 %v1491_v37  ;;  %v1529_v37 = vld [vmem:[%s1724_s5 + $0x18] sm:$0xff]  }
  0x90   :  { %796 = vmatprep.subr.bf16.mxu0 %v1496_v38  ;;  %v1530_v38 = vld [vmem:[%s1724_s5 + $0x10] sm:$0xff]  }
  0x93   :  { %797 = vmatpush2.bf16.msra.mxu0 %v1494_v39  ;;  %v1531_v39 = vld [vmem:[%s1724_s5 + $0x8] sm:$0xff]  }
  0x94   :  { %798 = vmatprep.subr.bf16.mxu0 %v1499_v40  ;;  %v1532_v40 = vld [vmem:[%s1724_s5] sm:$0xff]   ;;  %s1608_s5 = smov [#allocation7]  }
  0x95   :  { %s1152_s16 = sshll.u32 %s1608_s5, 4  ;;  %s1153_s16 = int_to_ptr.vmem [resolvable:$true] %s1152_s16 }
  0x96   :  { %p1578_p11 = scmp.lt.s32.totalorder %s1153_s16, %s1153_s16 }
  0x97   :  { %799 = vmatpush2.bf16.msra.mxu0 %v1497_v41 }
  0x98   :  { %800 = vmatprep.subr.bf16.mxu0 %v1505_v42  ;;  %v1268_v42 = vld [vmem:[%s1723_s4] ss:$0 sm:$0xff]  ;;  %s1573_s4 = scalar_lea.vmem %s1153_s16, 128 }
  0x99   :  { %p1574_p10 = scmp.ne.s32.totalorder %s1153_s16, %s1573_s4  ;;  %p1579_p12 = scmp.lt.s32.totalorder %s1573_s4, %s1573_s4 }
  0x9b   :  { %801 = vmatpush2.bf16.msra.mxu0 %v1503_v43  ;;  %p1580_p13 = por %p1579_p12, %p1578_p11 }
  0x9d   :  { %p1581_p0 = pnand %p1580_p13, %p1574_p10 }
  0x9e   :  { %803 = vmatmul.mubr.bf16.vlgmr.msra.gmra.mxu0 %v1166_v44 }
 0x11e   :  { %v722_v62 = vpop.f32.mrf.mxu0 }
 0x11f   :  { %v763_v0 = vpop.f32.mrf.mxu1  ;;  %v723_v17 = vadd.f32 %v722_v62, %v163_v15 }
 0x120   :  { %v724_v63 = vpop.f32.mrf.mxu0 }
 0x121   :  { %v765_v2 = vpop.f32.mrf.mxu1  ;;  %v725_v18 = vadd.f32 %v724_v63, %v167_v16  ;;  %v764_v19 = vadd.f32 %v763_v0, %v723_v17 }
 0x122   :  { %v726_v1 = vpop.f32.mrf.mxu0 }
 0x123   :  { %v767_v4 = vpop.f32.mrf.mxu1  ;;  %v766_v21 = vadd.f32 %v765_v2, %v725_v18 }
 0x124   :  { %v727_v3 = vpop.f32.mrf.mxu0 }
 0x125   :  { %v768_v5 = vpop.f32.mrf.mxu1 }
 0x127   :  { %v845_v6 = vpop.f32.mrf.mxu1 }
 0x129   :  { %v847_v7 = vpop.f32.mrf.mxu1 }
 0x12b   :  { %v849_v8 = vpop.f32.mrf.mxu1 }
 0x12d   :  { %v850_v9 = vpop.f32.mrf.mxu1 }
 0x15e   :  { %v804_v20 = vpop.f32.mrf.mxu0 }
 0x15f   :  { %v805_v22 = vadd.f32 %v804_v20, %v764_v19 }
 0x160   :  { %v806_v23 = vpop.f32.mrf.mxu0 }
 0x161   :  { %v846_v24 = vadd.f32 %v845_v6, %v805_v22  ;;  %v807_v25 = vadd.f32 %v806_v23, %v766_v21 }
 0x162   :  { %v808_v26 = vpop.f32.mrf.mxu0 }
 0x163   :  { %v848_v27 = vadd.f32 %v847_v7, %v807_v25  ;;  %v852_v28 = vmax.f32 %v846_v24, 0.0 }
 0x164   :  { %v809_v29 = vpop.f32.mrf.mxu0 }
 0x165   :  { %v853_v30 = vmax.f32 %v848_v27, 0.0  ;;  %v854_v33 = vpack.c.bf16 %v852_v28, %v852_v28 }
 0x167   :  { %v855_v31 = vpack.c.bf16 %v853_v30, %v853_v30 }
 0x169   :  { %1023 = vmatprep.mubr.bf16.mxu1 %v855_v31 }
 0x16a   :  { %1024 = vmatmul.mubr.bf16.vlgmr.msra.gmra.mxu1 %v854_v33 }
 0x16b   :  { %1326 = vmatpush3.bf16.msra.mxu1 %v1525_v32  ;;  %1341 = vmatprep.mubr.msk.bf16.mxu1 %vm1607_vm1, %v1606_v61 }
 0x16c   :  { %1327 = vmatprep.subr.bf16.mxu1 %v1606_v61 }
 0x16f   :  { %1328 = vmatpush3.bf16.msra.mxu1 %v1526_v34 }
 0x170   :  { %1329 = vmatprep.subr.bf16.mxu1 %v1606_v61 }
 0x173   :  { %1330 = vmatpush3.bf16.msra.mxu1 %v1527_v35 }
 0x174   :  { %1331 = vmatprep.subr.bf16.mxu1 %v1606_v61 }
 0x177   :  { %1332 = vmatpush3.bf16.msra.mxu1 %v1528_v36 }
 0x178   :  { %1333 = vmatprep.subr.bf16.mxu1 %v1606_v61 }
 0x17b   :  { %1334 = vmatpush3.bf16.msra.mxu1 %v1529_v37 }
 0x17c   :  { %1335 = vmatprep.subr.bf16.mxu1 %v1606_v61 }
 0x17f   :  { %1336 = vmatpush3.bf16.msra.mxu1 %v1530_v38 }
 0x180   :  { %1337 = vmatprep.subr.bf16.mxu1 %v1606_v61 }
 0x183   :  { %1338 = vmatpush3.bf16.msra.mxu1 %v1531_v39 }
 0x184   :  { %1339 = vmatprep.subr.bf16.mxu1 %v1606_v61 }
 0x187   :  { %1340 = vmatpush3.bf16.msra.mxu1 %v1532_v40 }
 0x22a   :  { %v1310_v41 = vpop.f32.mrf.mxu1 }
 0x22c   :  { %v1311_v43 = vpop.f32.mrf.mxu1 }
 0x22d   :  { %v1312_v44 = vadd.f32 %v1311_v43, %v1310_v41 }
 0x22e   :  { %v1313_v45 = vpop.f32.mrf.mxu1 }
 0x22f   :  { %v1026_v46 = vadd.f32 %v1312_v44, %v1268_v42 }
 0x230   :  { %v1314_v47 = vpop.f32.mrf.mxu1 }
 0x231   :  { %v1031_v48 = vmax.f32 %v1026_v46, 0.0 }
 0x233   :  { %v1032_v49 = vpack.c.bf16 %v1031_v48, %v1031_v48 }
 0x235   :  { %1342 = vmatmul.mubr.bf16.vlgmr.msra.gmra.mxu1 %v1032_v49 }
 0x2f5   :  { %v1138_v51 = vpop.f32.mrf.mxu1 }
 0x2f6   :  { %v1139_v52 = vadd.f32 %v1285_v50, %v1138_v51 }
 0x2f7   :  { %v1343_v53 = vpop.f32.mrf.mxu1 }
 0x2f8   :  { %1145 = vst.msk [vmem:[#allocation7] sm:$0xff] %vm1144_vm2, %v1139_v52 }
 0x2f9   :  { %v1141_v54 = vpop.f32.mrf.mxu1 }
 0x2fa   :  { %1584 = shalt.err (!%p1581_p0)
}
 0x2fb   :  { %1155 = dma.vmem_to_hbm [thread:$0]  %s1153_s16, 128, %s1726_s7, [#allocation4]   ;;  %v1344_v55 = vpop.f32.mrf.mxu1 }
 0x2fc   :  { %1597 = dma.done.wait [#allocation4], 128  }
 0x2fd   :  { %1598 = vsyncadd [#allocation4], 4294967168 }
 0x2fe   :  { %1159 = vsyncpa [#allocation3], 1 }
 0x2ff   :  { %1160 = vsyncpa [#allocation6], 1 }
 0x300   :  { %1161 = vsyncpa [#allocation4], 1 }

</bundles_post_ra>
